<compile_context>
chip_gen: v7x
topology: tpu7x:2x2x1
jax: 0.10.0
libtpu: 0.0.40
codegen_flags: <defaults>
</compile_context>

<pallas_src>
import functools
import math

import jax
import jax.numpy as jnp
from jax import lax
from jax.experimental import pallas as pl
from jax.experimental.pallas import tpu as pltpu

# ----------------- small, deterministic configuration -----------------
SAMPLE_SIZE = 8
NUM_DIMENSIONS = 2
SHARED_LAYER_SIZES = [32, 32]     # backbone
STDDEV_LAYER_SIZES = [16]         # stddev head hidden layers (exactly one, see assert)
CLASS_LAYER_SIZES = [16]          # classification head hidden layers (exactly one)
NUM_CLASSES = 4
BATCH = 2

D_IN = SAMPLE_SIZE * NUM_DIMENSIONS
HIDDEN = SHARED_LAYER_SIZES[-1]
ND = NUM_DIMENSIONS
NC = NUM_CLASSES
CH = CLASS_LAYER_SIZES[0]
SH = STDDEV_LAYER_SIZES[0]

assert len(STDDEV_LAYER_SIZES) == 1 and len(CLASS_LAYER_SIZES) == 1, (
    "fused two-stage head packing assumes exactly one hidden layer per head")
# TODO(synk): generalize the stage-2 block-diagonal packing to deeper head chains.

# fused widths / static slab offsets
H1_W = ND * CH + ND * SH + ND * 3 + ND      # 72: [cls_hid | std_hid | support | mean]
HID_W = ND * (CH + SH)                      # 64: the ReLU'd part of stage-1
H2_W = ND * NC + ND                         # 10: [cls_out | std_raw]
OUT_W = H2_W + ND * 3 + ND                  # 18: [cls | std | support | mean]

_BB_DIMS = [D_IN] + SHARED_LAYER_SIZES
N_BB = len(SHARED_LAYER_SIZES)
R_H1 = sum(_BB_DIMS[:-1])                   # backbone weight rows come first
R_H2 = R_H1 + HIDDEN
W_ROWS = R_H2 + HID_W
B_ROWS = N_BB + 2
SLAB_W = 128 * ((max(H1_W, H2_W, max(SHARED_LAYER_SIZES)) + 127) // 128)   # 128


# ----------------- parameter init (kaiming-normal weights, zero bias) -----------------
def _kaiming(key, fan_in, shape):
    std = math.sqrt(2.0 / fan_in)
    return std * jax.random.normal(key, shape, dtype=jnp.float32)


def init_params(key):
    keys = iter(jax.random.split(key, 64))
    p = {}

    dims = [D_IN] + SHARED_LAYER_SIZES
    p["backbone"] = [
        (_kaiming(next(keys), dims[i], (dims[i], dims[i + 1])),
         jnp.zeros((1, dims[i + 1]), jnp.float32))
        for i in range(len(SHARED_LAYER_SIZES))
    ]

    # mean heads: one Linear(HIDDEN, 1) per dimension -> stacked (ND, HIDDEN)
    p["mean_w"] = _kaiming(next(keys), HIDDEN, (ND, HIDDEN))
    p["mean_b"] = jnp.zeros((ND, 1), jnp.float32)

    # stddev heads: Linear(HIDDEN, SH) + ReLU, Linear(SH, 1), then sqrt(clamp(abs))
    p["std_hidden"] = [
        (_kaiming(next(keys), HIDDEN, (ND, HIDDEN, SH)), jnp.zeros((ND, SH), jnp.float32))
    ]
    p["std_w2"] = _kaiming(next(keys), SH, (ND, SH))
    p["std_b2"] = jnp.zeros((ND, 1), jnp.float32)

    # classification heads: Linear(HIDDEN, CH) + ReLU, Linear(CH, NUM_CLASSES)
    p["cls_hidden"] = [
        (_kaiming(next(keys), HIDDEN, (ND, HIDDEN, CH)), jnp.zeros((ND, CH), jnp.float32))
    ]
    p["cls_w2"] = _kaiming(next(keys), CH, (ND, CH, NC))
    p["cls_b2"] = jnp.zeros((ND, NC), jnp.float32)

    # support heads: single Linear(HIDDEN, 3) per dimension
    p["sup_w"] = _kaiming(next(keys), HIDDEN, (ND, HIDDEN, 3))
    p["sup_b"] = jnp.zeros((ND, 3), jnp.float32)
    return p


# ----------------- pack all weights/biases into two slabs (done ONCE, outside kernel) ----
def pack_params(p):
    w = jnp.zeros((W_ROWS, SLAB_W), jnp.float32)
    b = jnp.zeros((B_ROWS, SLAB_W), jnp.float32)

    # backbone layers
    r = 0
    for i, (wi, bi) in enumerate(p["backbone"]):
        w = w.at[r:r + wi.shape[0], 0:wi.shape[1]].set(wi)
        b = b.at[i, 0:wi.shape[1]].set(bi.reshape(-1))
        r += wi.shape[0]

    # stage-1 fused head weight (HIDDEN, H1_W): [cls_hid | std_hid | support | mean]
    cls_w1, cls_b1 = p["cls_hidden"][0]       # (ND, HIDDEN, CH), (ND, CH)
    std_w1, std_b1 = p["std_hidden"][0]       # (ND, HIDDEN, SH), (ND, SH)
    w1_cols = ([cls_w1[n] for n in range(ND)]
               + [std_w1[n] for n in range(ND)]
               + [p["sup_w"][n] for n in range(ND)]
               + [p["mean_w"][n].reshape(HIDDEN, 1) for n in range(ND)])
    w1 = jnp.concatenate(w1_cols, axis=1)                      # (HIDDEN, 72)
    b1 = jnp.concatenate([cls_b1.reshape(-1), std_b1.reshape(-1),
                          p["sup_b"].reshape(-1), p["mean_b"].reshape(-1)])
    w = w.at[R_H1:R_H1 + HIDDEN, 0:H1_W].set(w1)
    b = b.at[N_BB, 0:H1_W].set(b1)

    # stage-2 block-diagonal weight (HID_W, H2_W): cls finals then std finals
    w2 = jnp.zeros((HID_W, H2_W), jnp.float32)
    for n in range(ND):
        w2 = w2.at[n * CH:(n + 1) * CH, n * NC:(n + 1) * NC].set(p["cls_w2"][n])
    for n in range(ND):
        r0 = ND * CH + n * SH
        w2 = w2.at[r0:r0 + SH, ND * NC + n].set(p["std_w2"][n])
    b2 = jnp.concatenate([p["cls_b2"].reshape(-1), p["std_b2"].reshape(-1)])
    w = w.at[R_H2:R_H2 + HID_W, 0:H2_W].set(w2)
    b = b.at[N_BB + 1, 0:H2_W].set(b2)
    return w, b


# ----------------- fused Pallas kernel -----------------
def _make_kernel(compute_dtype):
    def kernel(x_ref, w_ref, b_ref, o_ref):
        # shared backbone: Linear + ReLU chain (f32 accumulate on the MXU)
        h = x_ref[...]
        r = 0
        for i in range(N_BB):
            w = w_ref[r:r + _BB_DIMS[i], 0:_BB_DIMS[i + 1]]
            h = jnp.dot(h.astype(compute_dtype), w.astype(compute_dtype),
                        preferred_element_type=jnp.float32)
            h = jnp.maximum(h + b_ref[i:i + 1, 0:_BB_DIMS[i + 1]], 0.0)
            r += _BB_DIMS[i]

        # stage 1: one fused matmul for all heads / dims -> (TB, 72)
        y1 = jnp.dot(h.astype(compute_dtype),
                     w_ref[R_H1:R_H1 + HIDDEN, 0:H1_W].astype(compute_dtype),
                     preferred_element_type=jnp.float32) + b_ref[N_BB:N_BB + 1, 0:H1_W]
        hid = jnp.maximum(y1[:, 0:HID_W], 0.0)     # cls/std hidden activations
        tail = y1[:, HID_W:H1_W]                   # [sup0 | sup1 | mean0 | mean1]

        # stage 2: block-diagonal matmul -> (TB, 10) = [cls0 | cls1 | stdraw0 | stdraw1]
        y2 = jnp.dot(hid.astype(compute_dtype),
                     w_ref[R_H2:R_H2 + HID_W, 0:H2_W].astype(compute_dtype),
                     preferred_element_type=jnp.float32) + b_ref[N_BB + 1:N_BB + 2, 0:H2_W]

        # stddev activation only on the last ND columns; identity on the cls columns.
        # (lane-mask select avoids a sub-vreg lane slice + re-concat)
        col = lax.broadcasted_iota(jnp.int32, y2.shape, 1)
        y2 = jnp.where(col < ND * NC, y2,
                       jnp.sqrt(jnp.clip(jnp.abs(y2), 1e-6, 1e6)))

        # single lane-concatenated output slab: [cls(8) | std(2) | support(6) | mean(2)]
        o_ref[...] = jnp.concatenate([y2, tail], axis=1)

    return kernel


@functools.partial(jax.jit, static_argnames=("use_bf16",))
def multitask_forward(x, w_slab, b_slab, use_bf16=False):
    b = x.shape[0]
    compute_dtype = jnp.bfloat16 if use_bf16 else jnp.float32
    if use_bf16:
        # bf16 MXU operands; f32 accumulate + f32 biases / ReLU / sqrt in the kernel.
        x = x.astype(jnp.bfloat16)
        w_slab = w_slab.astype(jnp.bfloat16)

    # batch grid (parallel axis -> megacore / v7x 2-TC sharding). Demo-scale tiling:
    # full batch per step for tiny B, 512-row tiles otherwise.
    tb = b if b <= 512 else 512
    grid = (pl.cdiv(b, tb),)

    slab = pl.pallas_call(
        _make_kernel(compute_dtype),
        out_shape=jax.ShapeDtypeStruct((b, OUT_W), jnp.float32),
        grid=grid,
        in_specs=[
            pl.BlockSpec((tb, D_IN), lambda i: (i, 0)),          # x tile
            pl.BlockSpec((W_ROWS, SLAB_W), lambda i: (0, 0)),    # packed weights (resident)
            pl.BlockSpec((B_ROWS, SLAB_W), lambda i: (0, 0)),    # packed biases (resident)
        ],
        out_specs=pl.BlockSpec((tb, OUT_W), lambda i: (i, 0)),
        compiler_params=pltpu.CompilerParams(
            dimension_semantics=("parallel",)),
    )(x, w_slab, b_slab)

    cls = slab[:, 0:ND * NC].reshape(b, ND, NC)
    std = slab[:, ND * NC:ND * NC + ND]
    sup = slab[:, H2_W:H2_W + 3 * ND].reshape(b, ND, 3)
    mean = slab[:, H2_W + 3 * ND:OUT_W]
    return {"classification": cls, "mean": mean, "stddev": std, "support": sup}


# ----------------- pure-JAX reference (for correctness check) -----------------
def reference_forward(x, p):
    h = x
    for w, b in p["backbone"]:
        h = jnp.maximum(h @ w + b, 0.0)
    cls_l, sup_l, mean_l, std_l = [], [], [], []
    for n in range(ND):
        c = h
        for w, b in p["cls_hidden"]:
            c = jnp.maximum(c @ w[n] + b[n], 0.0)
        cls_l.append(c @ p["cls_w2"][n] + p["cls_b2"][n])

        sup_l.append(h @ p["sup_w"][n] + p["sup_b"][n])

        mean_l.append(jnp.sum(h * p["mean_w"][n], axis=-1) + p["mean_b"][n, 0])

        t = h
        for w, b in p["std_hidden"]:
            t = jnp.maximum(t @ w[n] + b[n], 0.0)
        t = jnp.sum(t * p["std_w2"][n], axis=-1) + p["std_b2"][n, 0]
        std_l.append(jnp.sqrt(jnp.clip(jnp.abs(t), 1e-6, 1e6)))
    return {
        "classification": jnp.stack(cls_l, axis=1),
        "mean": jnp.stack(mean_l, axis=1),
        "stddev": jnp.stack(std_l, axis=1),
        "support": jnp.stack(sup_l, axis=1),
    }


if __name__ == "__main__":
    key = jax.random.PRNGKey(0)
    kx, kp = jax.random.split(key)
    x = jax.random.normal(kx, (BATCH, D_IN), dtype=jnp.float32)
    params = init_params(kp)

    # pack weights/biases once (would be reused across all forward calls)
    w_slab, b_slab = pack_params(params)
    w_slab, b_slab = jax.block_until_ready((w_slab, b_slab))

    # f32 path: exact match against the reference
    out = multitask_forward(x, w_slab, b_slab)
    jax.block_until_ready(out)
    ref = reference_forward(x, params)
    assert out["classification"].shape == (BATCH, ND, NC)
    assert out["support"].shape == (BATCH, ND, 3)
    assert out["mean"].shape == (BATCH, ND)
    assert out["stddev"].shape == (BATCH, ND)
    for k in ("classification", "mean", "stddev", "support"):
        assert jnp.allclose(out[k], ref[k], atol=1e-5, rtol=1e-5), k

    # bf16 MXU-operand path (v5e/v6e/v7x perf mode): loose tolerance, f32 accumulate.
    out_bf16 = multitask_forward(x, w_slab, b_slab, use_bf16=True)
    jax.block_until_ready(out_bf16)
    for k in ("classification", "mean", "support"):
        assert jnp.allclose(out_bf16[k], ref[k], atol=1e-1, rtol=1e-1), k
    assert out_bf16["stddev"].shape == (BATCH, ND)
    assert bool(jnp.all(jnp.isfinite(out_bf16["stddev"])))

    print("KERNEL_OK")
</pallas_src>

<mosaic_0001>
module attributes {stable_mosaic.version = 11 : i64} {
  func.func @kernel(%arg0: i32, %arg1: memref<2x16xf32, #tpu.memory_space<vmem>>, %arg2: memref<144x128xf32, #tpu.memory_space<vmem>>, %arg3: memref<4x128xf32, #tpu.memory_space<vmem>>, %arg4: memref<2x18xf32, #tpu.memory_space<vmem>>) attributes {dimension_semantics = [#tpu.dimension_semantics<parallel>], iteration_bounds = array<i64: 1>, scalar_prefetch = 0 : i64, scratch_operands = 0 : i64, tpu.core_type = #tpu.core_type<tc>, window_params = [{transform_indices = @transform_0, window_bounds = array<i64: 2, 16>}, {pipeline_mode = #tpu.pipeline_mode<synchronous>, transform_indices = @transform_1, window_bounds = array<i64: 144, 128>}, {pipeline_mode = #tpu.pipeline_mode<synchronous>, transform_indices = @transform_2, window_bounds = array<i64: 4, 128>}, {transform_indices = @transform_3, window_bounds = array<i64: 2, 18>}]} {
    %c0 = arith.constant 0 : index
    %c0_0 = arith.constant 0 : index
    %0 = vector.load %arg1[%c0, %c0_0] : memref<2x16xf32, #tpu.memory_space<vmem>>, vector<2x16xf32>
    %c0_1 = arith.constant 0 : index
    %c0_2 = arith.constant 0 : index
    %1 = vector.load %arg2[%c0_1, %c0_2] : memref<144x128xf32, #tpu.memory_space<vmem>>, vector<16x32xf32>
    %cst = arith.constant dense<0.000000e+00> : vector<2x32xf32>
    %2 = tpu.matmul %0, %1, %cst {dimension_numbers = #tpu.dot_dimension_numbers<[1], [0], [0], [1], [0, 0, 1, 1], [], []>} : vector<2x16xf32>, vector<16x32xf32>, vector<2x32xf32> -> vector<2x32xf32>
    %c0_3 = arith.constant 0 : index
    %c0_4 = arith.constant 0 : index
    %3 = vector.load %arg3[%c0_3, %c0_4] : memref<4x128xf32, #tpu.memory_space<vmem>>, vector<1x32xf32>
    %4 = vector.broadcast %3 : vector<1x32xf32> to vector<2x32xf32>
    %5 = arith.addf %2, %4 : vector<2x32xf32>
    %cst_5 = arith.constant 0.000000e+00 : f32
    %6 = vector.broadcast %cst_5 : f32 to vector<2x32xf32>
    %7 = arith.maximumf %5, %6 : vector<2x32xf32>
    %c16 = arith.constant 16 : index
    %c0_6 = arith.constant 0 : index
    %8 = vector.load %arg2[%c16, %c0_6] : memref<144x128xf32, #tpu.memory_space<vmem>>, vector<32x32xf32>
    %cst_7 = arith.constant dense<0.000000e+00> : vector<2x32xf32>
    %9 = tpu.matmul %7, %8, %cst_7 {dimension_numbers = #tpu.dot_dimension_numbers<[1], [0], [0], [1], [0, 0, 1, 1], [], []>} : vector<2x32xf32>, vector<32x32xf32>, vector<2x32xf32> -> vector<2x32xf32>
    %c1 = arith.constant 1 : index
    %c0_8 = arith.constant 0 : index
    %10 = vector.load %arg3[%c1, %c0_8] : memref<4x128xf32, #tpu.memory_space<vmem>>, vector<1x32xf32>
    %11 = vector.broadcast %10 : vector<1x32xf32> to vector<2x32xf32>
    %12 = arith.addf %9, %11 : vector<2x32xf32>
    %cst_9 = arith.constant 0.000000e+00 : f32
    %13 = vector.broadcast %cst_9 : f32 to vector<2x32xf32>
    %14 = arith.maximumf %12, %13 : vector<2x32xf32>
    %c48 = arith.constant 48 : index
    %c0_10 = arith.constant 0 : index
    %15 = vector.load %arg2[%c48, %c0_10] : memref<144x128xf32, #tpu.memory_space<vmem>>, vector<32x72xf32>
    %cst_11 = arith.constant dense<0.000000e+00> : vector<2x72xf32>
    %16 = tpu.matmul %14, %15, %cst_11 {dimension_numbers = #tpu.dot_dimension_numbers<[1], [0], [0], [1], [0, 0, 1, 1], [], []>} : vector<2x32xf32>, vector<32x72xf32>, vector<2x72xf32> -> vector<2x72xf32>
    %c2 = arith.constant 2 : index
    %c0_12 = arith.constant 0 : index
    %17 = vector.load %arg3[%c2, %c0_12] : memref<4x128xf32, #tpu.memory_space<vmem>>, vector<1x72xf32>
    %18 = vector.broadcast %17 : vector<1x72xf32> to vector<2x72xf32>
    %19 = arith.addf %16, %18 : vector<2x72xf32>
    %20 = vector.extract_strided_slice %19 {offsets = [0, 0], sizes = [2, 64], strides = [1, 1]} : vector<2x72xf32> to vector<2x64xf32>
    %cst_13 = arith.constant 0.000000e+00 : f32
    %21 = vector.broadcast %cst_13 : f32 to vector<2x64xf32>
    %22 = arith.maximumf %20, %21 : vector<2x64xf32>
    %23 = vector.extract_strided_slice %19 {offsets = [0, 64], sizes = [2, 8], strides = [1, 1]} : vector<2x72xf32> to vector<2x8xf32>
    %c80 = arith.constant 80 : index
    %c0_14 = arith.constant 0 : index
    %24 = vector.load %arg2[%c80, %c0_14] : memref<144x128xf32, #tpu.memory_space<vmem>>, vector<64x10xf32>
    %cst_15 = arith.constant dense<0.000000e+00> : vector<2x10xf32>
    %25 = tpu.matmul %22, %24, %cst_15 {dimension_numbers = #tpu.dot_dimension_numbers<[1], [0], [0], [1], [0, 0, 1, 1], [], []>} : vector<2x64xf32>, vector<64x10xf32>, vector<2x10xf32> -> vector<2x10xf32>
    %c3 = arith.constant 3 : index
    %c0_16 = arith.constant 0 : index
    %26 = vector.load %arg3[%c3, %c0_16] : memref<4x128xf32, #tpu.memory_space<vmem>>, vector<1x10xf32>
    %27 = vector.broadcast %26 : vector<1x10xf32> to vector<2x10xf32>
    %28 = arith.addf %25, %27 : vector<2x10xf32>
    %29 = tpu.iota {dimensions = array<i32: 1>} : vector<2x10xi32>
    %c8_i32 = arith.constant 8 : i32
    %30 = vector.broadcast %c8_i32 : i32 to vector<2x10xi32>
    %31 = arith.cmpi slt, %29, %30 : vector<2x10xi32>
    %32 = math.absf %28 : vector<2x10xf32>
    %cst_17 = arith.constant 9.99999997E-7 : f32
    %cst_18 = arith.constant 1.000000e+06 : f32
    %33 = vector.broadcast %cst_17 : f32 to vector<2x10xf32>
    %34 = arith.maximumf %33, %32 : vector<2x10xf32>
    %35 = vector.broadcast %cst_18 : f32 to vector<2x10xf32>
    %36 = arith.minimumf %35, %34 : vector<2x10xf32>
    %37 = math.sqrt %36 : vector<2x10xf32>
    %38 = arith.select %31, %28, %37 : vector<2x10xi1>, vector<2x10xf32>
    %39 = tpu.concatenate %38, %23 in 1 : vector<2x10xf32>, vector<2x8xf32> -> vector<2x18xf32>
    %c0_19 = arith.constant 0 : index
    %c0_20 = arith.constant 0 : index
    %40 = vector.load %arg4[%c0_19, %c0_20] : memref<2x18xf32, #tpu.memory_space<vmem>>, vector<2x18xf32>
    tpu.vector_store %arg4[%c0_19, %c0_20], %39 {strides = array<i32>} : memref<2x18xf32, #tpu.memory_space<vmem>>, vector<2x18xf32>,
    return
  }
  func.func @transform_0(%arg0: i32) -> (i32, i32) {
    %c0_i32 = arith.constant 0 : i32
    %c0_i32_0 = arith.constant 0 : i32
    return %arg0, %c0_i32 : i32, i32
  }
  func.func @transform_1(%arg0: i32) -> (i32, i32) {
    %c0_i32 = arith.constant 0 : i32
    %c0_i32_0 = arith.constant 0 : i32
    %c0_i32_1 = arith.constant 0 : i32
    return %c0_i32, %c0_i32_0 : i32, i32
  }
  func.func @transform_2(%arg0: i32) -> (i32, i32) {
    %c0_i32 = arith.constant 0 : i32
    %c0_i32_0 = arith.constant 0 : i32
    %c0_i32_1 = arith.constant 0 : i32
    return %c0_i32, %c0_i32_0 : i32, i32
  }
  func.func @transform_3(%arg0: i32) -> (i32, i32) {
    %c0_i32 = arith.constant 0 : i32
    %c0_i32_0 = arith.constant 0 : i32
    return %arg0, %c0_i32 : i32, i32
  }
}

</mosaic_0001>

<bundles_post_ra>
// kernel: multitask_forward.1
= control target key start
LH: loop header
LB: loop body
LE: loop exit
PB: predicated region body
PF: predicated region fallthrough
CT: control target
= control target key end

     0   :  { %8 = vsyncpa [#allocation3], 0  ;;  %s648_s0 = inlined_call_operand.hbm [shape: f32[2,16], index: 0, kind: input, shape index: {}]   ;;  %s649_s1 = inlined_call_operand.hbm [shape: f32[144,128], index: 1, kind: input, shape index: {}]   ;;  %s650_s2 = inlined_call_operand.vmem [shape: f32[4,128], index: 2, kind: input, shape index: {}]   ;;  %s651_s3 = inlined_call_operand.vmem [shape: f32[2,18], index: 3, kind: output, shape index: {}]  }
   0x1   :  { %9 = vsyncpa [#allocation5], 0  ;;  %s568_s12 = smov [#allocation2]   ;;  %s569_s14 = smov [#allocation4]  }
   0x2   :  { %s16_s13 = sshll.u32 %s568_s12, 4  ;;  %s25_s15 = sshll.u32 %s569_s14, 4  ;;  %s17_s13 = int_to_ptr.vmem [resolvable:$true] %s16_s13  ;;  %s596_s15 = int_to_ptr.vmem [resolvable:$true] %s25_s15 }
   0x3   :  { %s520_s18 = scalar_lea.hbm %s648_s0, 32 }
   0x4   :  { %p521_p0 = scmp.ne.s32.totalorder %s648_s0, %s520_s18  ;;  %p524_p1 = scmp.lt.u32.totalorder %s520_s18, %s648_s0 }
   0x6   :  { %p526_p2 = pnand %p524_p1, %p521_p0 }
   0x8   :  { %529 = shalt.err (!%p526_p2)
}
   0x9   :  { %s530_s23 = scalar_lea.vmem %s17_s13, 32  ;;  %p535_p4 = scmp.lt.s32.totalorder %s17_s13, %s17_s13 }
   0xa   :  { %p531_p3 = scmp.ne.s32.totalorder %s17_s13, %s530_s23  ;;  %p536_p5 = scmp.lt.s32.totalorder %s530_s23, %s530_s23 }
   0xc   :  { %p537_p6 = por %p536_p5, %p535_p4 }
   0xe   :  { %p538_p7 = pnand %p537_p6, %p531_p3 }
  0x10   :  { %541 = shalt.err (!%p538_p7)
}
  0x11   :  { %19 = dma.hbm_to_vmem [thread:$0]  %s648_s0, 32, %s17_s13, [#allocation3]  }
  0x12   :  { %s542_s28 = scalar_lea.hbm %s649_s1, 2304 }
  0x13   :  { %p543_p8 = scmp.ne.s32.totalorder %s649_s1, %s542_s28  ;;  %p546_p9 = scmp.lt.u32.totalorder %s542_s28, %s649_s1 }
  0x15   :  { %p548_p10 = pnand %p546_p9, %p543_p8 }
  0x17   :  { %551 = shalt.err (!%p548_p10)
}
  0x18   :  { %s552_s6 = scalar_lea.vmem %s596_s15, 2304  ;;  %p557_p12 = scmp.lt.s32.totalorder %s596_s15, %s596_s15 }
  0x19   :  { %p553_p11 = scmp.ne.s32.totalorder %s596_s15, %s552_s6  ;;  %p558_p13 = scmp.lt.s32.totalorder %s552_s6, %s552_s6 }
  0x1b   :  { %p559_p0 = por %p558_p13, %p557_p12 }
  0x1d   :  { %p560_p1 = pnand %p559_p0, %p553_p11 }
  0x1f   :  { %563 = shalt.err (!%p560_p1)
}
  0x20   :  { %s570_s0 = smov 128   ;;  %s571_s7 = smov 8  }
  0x21   :  { %31 = dma.hbm_to_vmem [thread:$0]  %s649_s1, 2304, %s596_s15, [#allocation5], %s570_s0, %s570_s0, %s571_s7  }
  0x22   :  { %564 = dma.done.wait [#allocation3], 32  }
  0x23   :  { %565 = vsyncadd [#allocation3], 4294967264 }
  0x24   :  { %566 = dma.done.wait [#allocation5], 2304  }
  0x25   :  { %567 = vsyncadd [#allocation5], 4294964992  ;;  %v572_v0 = vmov 0.0|0.0   ;;  %vm573_vm0 = vmmov 0   ;;  %v574_v1 = vmov 0.0   ;;  %v41_v2 = vld [vmem:[#allocation4] sm:$0xff]  ;;  %v377_v52 = vlaneseq }
  0x26   :  { %483 = vmatprep.subr.bf16.mxu0 %v572_v0  ;;  %439 = vmatprep.mubr.msk.f32.mxu0 %vm573_vm0, %v574_v1  ;;  %v42_v3 = vld [vmem:[#allocation4 + $0x8] sm:$0xff]  ;;  %v123_v5 = vld [vmem:[#allocation4 + $0x10] sm:$0xff]  ;;  %v124_v6 = vld [vmem:[#allocation4 + $0x18] sm:$0xff]  ;;  %vm48_vm1 = vcmask 130048   ;;  %vm132_vm2 = vcmask 261120   ;;  %vm303_vm3 = vcmask 523264  }
  0x27   :  { %498 = vmatprep.subr.bf16.mxu1 %v572_v0  ;;  %480 = vmatprep.mubr.msk.f32.mxu1 %vm573_vm0, %v574_v1  ;;  %v484_v4 = vpack.c.bf16 %v42_v3, %v41_v2  ;;  %v40_v7 = vld [vmem:[#allocation2] sm:$0x3]  ;;  %v487_v8 = vpack.c.bf16 %v124_v6, %v123_v5  ;;  %v125_v9 = vld [vmem:[#allocation4 + $0x20] sm:$0xff]  ;;  %v126_v10 = vld [vmem:[#allocation4 + $0x28] sm:$0xff]  ;;  %s575_s15 = smov 74   ;;  %v378_v53 = vand.u32 127, %v377_v52 }
  0x28   :  { %v490_v11 = vpack.c.bf16 %v126_v10, %v125_v9  ;;  %v405_v12 = vld [vmem:[%s650_s2] ss:$0 sm:$0xff]  ;;  %v207_v13 = vld [vmem:[#allocation4 + $0x30] sm:$0xff]  ;;  %v209_v20 = vld [vmem:[#allocation4 + $0x40] sm:$0xff]  ;;  %vm395_vm7 = vcmask 80896   ;;  %vm397_vm8 = vcmask 140288  }
  0x29   :  { %485 = vmatpush3.bf16.msra.mxu0 %v484_v4  ;;  %v208_v14 = vld [vmem:[#allocation4 + $0x38] sm:$0xff]  ;;  %v210_v21 = vld [vmem:[#allocation4 + $0x48] sm:$0xff]  ;;  %v290_v23 = vld [vmem:[#allocation4 + $0x50] sm:$0xff]  ;;  %vm379_vm4 = vcmp.lt.s32.totalorder %v378_v53, 8 }
  0x2a   :  { %486 = vmatprep.subr.bf16.mxu0 %v572_v0  ;;  %v493_v18 = vpack.c.bf16 %v208_v14, %v207_v13  ;;  %v496_v22 = vpack.c.bf16 %v210_v21, %v209_v20  ;;  %v291_v24 = vld [vmem:[#allocation4 + $0x58] sm:$0xff]  ;;  %v292_v25 = vld [vmem:[#allocation4 + $0x60] sm:$0xff]  ;;  %v293_v27 = vld [vmem:[#allocation4 + $0x68] sm:$0xff] }
  0x2b   :  { %v499_v26 = vpack.c.bf16 %v291_v24, %v290_v23  ;;  %v502_v28 = vpack.c.bf16 %v293_v27, %v292_v25  ;;  %v294_v29 = vld [vmem:[#allocation4 + $0x70] sm:$0xff]  ;;  %v295_v30 = vld [vmem:[#allocation4 + $0x78] sm:$0xff]  ;;  %v296_v37 = vld [vmem:[#allocation4 + $0x80] sm:$0xff] }
  0x2c   :  { %440 = vmatmul.mubr.msk.f32.vlgmr.msra.gmra.mrb[0].mxu0 %vm48_vm1, %v40_v7  ;;  %v505_v31 = vpack.c.bf16 %v295_v30, %v294_v29  ;;  %v407_v32 = vld [vmem:[%s650_s2 + $0x1] ss:$0 sm:$0xff]  ;;  %v297_v38 = vld [vmem:[#allocation4 + $0x88] sm:$0xff]  ;;  %v409_v40 = vld [vmem:[%s650_s2 + $0x2] ss:$0 sm:$0xff] }
  0x2d   :  { %488 = vmatpush3.bf16.msra.mxu0 %v487_v8  ;;  %450 = vmatprep.mubr.msk.f32.mxu0 %vm573_vm0, %v574_v1  ;;  %v508_v39 = vpack.c.bf16 %v297_v38, %v296_v37  ;;  %v411_v45 = vld [vmem:[%s650_s2 + $0x3] ss:$0 sm:$0xff] }
  0x2e   :  { %489 = vmatprep.subr.bf16.mxu0 %v572_v0  ;;  %500 = vmatpush3.bf16.msra.mxu1 %v499_v26 }
  0x2f   :  { %501 = vmatprep.subr.bf16.mxu1 %v572_v0 }
  0x31   :  { %491 = vmatpush3.bf16.msra.mxu0 %v490_v11 }
  0x32   :  { %492 = vmatprep.subr.bf16.mxu0 %v572_v0  ;;  %503 = vmatpush3.bf16.msra.mxu1 %v502_v28 }
  0x33   :  { %504 = vmatprep.subr.bf16.mxu1 %v572_v0 }
  0x36   :  { %506 = vmatpush3.bf16.msra.mxu1 %v505_v31 }
  0x37   :  { %507 = vmatprep.subr.bf16.mxu1 %v572_v0 }
  0x3a   :  { %509 = vmatpush3.bf16.msra.mxu1 %v508_v39 }
  0xff   :  { %v118_v15 = vpop.f32.mrb[0].mxu0 }
 0x100   :  { %v119_v16 = vadd.f32 %v405_v12, %v118_v15  ;;  %v441_v17 = vpop.f32.mrb[1].mxu0 }
 0x102   :  { %v122_v19 = vmax.f32 %v119_v16, 0.0 }
 0x104   :  { %451 = vmatmul.mubr.msk.f32.vlgmr.msra.gmra.mrb[2].mxu0 %vm132_vm2, %v122_v19 }
 0x105   :  { %494 = vmatpush3.bf16.msra.mxu0 %v493_v18  ;;  %461 = vmatprep.mubr.msk.f32.mxu0 %vm573_vm0, %v574_v1 }
 0x106   :  { %495 = vmatprep.subr.bf16.mxu0 %v572_v0 }
 0x109   :  { %497 = vmatpush3.bf16.msra.mxu0 %v496_v22 }
 0x1d7   :  { %v202_v33 = vpop.f32.mrb[2].mxu0 }
 0x1d8   :  { %v203_v34 = vadd.f32 %v407_v32, %v202_v33  ;;  %v452_v35 = vpop.f32.mrb[3].mxu0 }
 0x1da   :  { %v206_v36 = vmax.f32 %v203_v34, 0.0 }
 0x1dc   :  { %462 = vmatmul.mubr.msk.f32.vlgmr.msra.gmra.mrb[4].mxu0 %vm132_vm2, %v206_v36 }
 0x2af   :  { %v285_v41 = vpop.f32.mrb[4].mxu0 }
 0x2b0   :  { %v286_v42 = vadd.f32 %v409_v40, %v285_v41  ;;  %v463_v43 = vpop.f32.mrb[5].mxu0 }
 0x2b2   :  { %v289_v44 = vmax.f32 %v286_v42, 0.0  ;;  %392 = vrot.lane.b32.xlu0 %v286_v42, %s575_s15 }
 0x2b4   :  { %481 = vmatmul.mubr.msk.f32.vlgmr.msra.gmra.mrb[0].mxu1 %vm303_vm3, %v289_v44 }
 0x324   :  { %v393_v59 = vpop.permute.xlu0 %392 }
 0x387   :  { %v373_v46 = vpop.f32.mrb[0].mxu1 }
 0x388   :  { %v374_v47 = vadd.f32 %v411_v45, %v373_v46  ;;  %v482_v48 = vpop.f32.mrb[1].mxu1 }
 0x38a   :  { %v380_v49 = vand.u32 2147483647, %v374_v47 }
 0x38c   :  { %v381_v50 = vmax.f32 %v380_v49, 1e-06 }
 0x38e   :  { %v382_v51 = vmin.f32 %v381_v50, 1000000.0 }
 0x390   :  { %518 = vrsqrt.f32 %v382_v51  ;;  %vm385_vm5 = vcmp.eq.f32.partialorder %v382_v51, inf  ;;  %v388_v56 = vand.u32 2147483648, %v382_v51  ;;  %vm387_vm6 = vcmp.eq.f32.partialorder %v382_v51, 0.0 }
 0x39a   :  { %v519_v54 = vpop.eup %518 }
 0x39b   :  { %v384_v55 = vmul.f32 %v519_v54, %v382_v51 }
 0x39d   :  { %v386_v57 = vsel %vm385_vm5, %v382_v51, %v384_v55 }
 0x39e   :  { %v389_v58 = vsel %vm387_vm6, %v388_v56, %v386_v57 }
 0x39f   :  { %v390_v60 = vsel %vm379_vm4, %v374_v47, %v389_v58 }
 0x3a0   :  { %v396_v61 = vsel %vm395_vm7, %v390_v60, %v393_v59 }
 0x3a1   :  { %398 = vst.msk [vmem:[%s651_s3] sm:$0x3] %vm397_vm8, %v396_v61 }
 0x3a2   :  { %403 = vsyncpa [#allocation3], 1 }
 0x3a3   :  { %404 = vsyncpa [#allocation5], 1 }

</bundles_post_ra>
